<compile_context>
chip_gen: v5e
topology: v5e:2x2
jax: 0.10.0
libtpu: 0.0.40
codegen_flags: <defaults>
</compile_context>

<pallas_src>
import functools

import jax
import jax.numpy as jnp
from jax.experimental import pallas as pl
from jax.experimental.pallas import tpu as pltpu


NEGATIVE_SLOPE = 0.01  # matches F.leaky_relu default used in the module


def _leaky_relu(x):
    return jnp.where(x > 0, x, NEGATIVE_SLOPE * x)


def _round_up(x, m):
    return ((x + m - 1) // m) * m


def central_critic_kernel(obs_ref, act_ref, prm_ref,
                          w1o_ref, w1a_ref, w1p_ref, b1_ref,
                          w2_ref, b2_ref,
                          wo_ref, bo_ref,
                          q_ref):
    mxu_dtype = w1o_ref.dtype  # bf16

    # h1 = leaky_relu(concat(obs, act, prm) @ W1 + b1)
    # The concat is replaced by three MXU dots summed into one f32 accumulator.
    # Activations arrive in f32 (half the HBM traffic of a pre-cast bf16 copy)
    # and are cast on the VPU, hidden under the DMA / MXU pipeline.
    h1 = jnp.dot(obs_ref[...].astype(mxu_dtype), w1o_ref[...],
                 preferred_element_type=jnp.float32)
    h1 = h1 + jnp.dot(act_ref[...].astype(mxu_dtype), w1a_ref[...],
                      preferred_element_type=jnp.float32)
    h1 = h1 + jnp.dot(prm_ref[...].astype(mxu_dtype), w1p_ref[...],
                      preferred_element_type=jnp.float32)
    h1 = _leaky_relu(h1 + b1_ref[...])                       # f32 VPU path

    # h2 = leaky_relu(h1 @ W2 + b2)   (bf16 MXU inputs, f32 accumulation)
    h2 = jnp.dot(h1.astype(mxu_dtype), w2_ref[...],
                 preferred_element_type=jnp.float32)
    h2 = _leaky_relu(h2 + b2_ref[...])                        # (TB, h1dim) f32

    # Output head (out_features == 1), produced directly as a lane-dense
    # (1, TB) row: contract wo (1, h1dim) against h2's feature axis (f32).
    q_row = jnp.einsum("oh,bh->ob", wo_ref[...], h2,
                       preferred_element_type=jnp.float32)    # (1, TB)
    q_row = q_row + bo_ref[...]
    q_ref[...] = q_row[None].astype(q_ref.dtype)              # (1, 1, TB)


@functools.partial(jax.jit, static_argnames=("batch_tile",))
def central_critic_forward(obs, actions, action_parameters, params,
                           *, batch_tile=1024):
    """params: dict with w1,b1,w2,b2,wo,bo.  Weights are [in, out]."""
    B = obs.shape[0]
    obs_dim = obs.shape[1]
    act_dim = actions.shape[1]
    prm_dim = action_parameters.shape[1]

    w1, b1 = params["w1"], params["b1"]
    w2, b2 = params["w2"], params["b2"]
    wo, bo = params["wo"], params["bo"]
    h0 = w1.shape[1]
    h1dim = w2.shape[1]

    # Split W1 so the kernel never concatenates along the lane axis.
    w1_obs = w1[:obs_dim]
    w1_act = w1[obs_dim:obs_dim + act_dim]
    w1_prm = w1[obs_dim + act_dim:]

    # Weights / biases cast once in the wrapper (tiny, VMEM-resident in the
    # kernel).  Activations stay f32 in HBM; the kernel casts before each dot.
    mxu_dtype = jnp.bfloat16
    w1_obs = w1_obs.astype(mxu_dtype)
    w1_act = w1_act.astype(mxu_dtype)
    w1_prm = w1_prm.astype(mxu_dtype)
    w2_b = w2.astype(mxu_dtype)
    b1_f = b1.reshape(1, h0).astype(jnp.float32)
    b2_f = b2.reshape(1, h1dim).astype(jnp.float32)
    wo_row = wo.reshape(1, h1dim).astype(jnp.float32)
    bo_f = bo.reshape(1, 1).astype(jnp.float32)

    obs_f = obs.astype(jnp.float32)
    act_f = actions.astype(jnp.float32)
    prm_f = action_parameters.astype(jnp.float32)

    # Batch tiling: TB is the main tuning knob (sweep 512/1024/2048/4096).
    # No jnp.pad: Pallas masks the ragged final batch tile; garbage rows
    # (>= B) only land in output rows that are sliced off below.
    TB = max(8, min(_round_up(batch_tile, 8), _round_up(B, 8)))
    n_tiles = pl.cdiv(B, TB)

    def weight_spec(a):
        nd = a.ndim
        return pl.BlockSpec(a.shape, lambda i, _nd=nd: (0,) * _nd)

    q_tiles = pl.pallas_call(
        central_critic_kernel,
        out_shape=jax.ShapeDtypeStruct((n_tiles, 1, TB), jnp.float32),
        grid=(n_tiles,),
        in_specs=[
            pl.BlockSpec((TB, obs_dim), lambda i: (i, 0)),
            pl.BlockSpec((TB, act_dim), lambda i: (i, 0)),
            pl.BlockSpec((TB, prm_dim), lambda i: (i, 0)),
            weight_spec(w1_obs), weight_spec(w1_act), weight_spec(w1_prm),
            weight_spec(b1_f),
            weight_spec(w2_b), weight_spec(b2_f),
            weight_spec(wo_row), weight_spec(bo_f),
        ],
        out_specs=pl.BlockSpec((1, 1, TB), lambda i: (i, 0, 0)),
        compiler_params=pltpu.CompilerParams(
            dimension_semantics=("parallel",),
            vmem_limit_bytes=32 * 1024 * 1024,
        ),
    )(obs_f, act_f, prm_f,
      w1_obs, w1_act, w1_prm, b1_f,
      w2_b, b2_f,
      wo_row, bo_f)

    # Lane-dense (n_tiles, 1, TB) -> (B, 1)
    return q_tiles.reshape(n_tiles * TB)[:B].reshape(B, 1)


def init_central_critic_params(key, obs_dim, act_dim, param_dim,
                               hidden_layers, num_agents, init_std=0.01):
    """Mirrors CentralCritic.__init__ with init_type='normal':
       weights ~ N(0, init_std), biases zero.  Returned weights are the
       transpose of the PyTorch nn.Linear weight (i.e. [in, out])."""
    obs_dim *= num_agents
    act_dim *= num_agents
    param_dim *= num_agents
    input_size = obs_dim + act_dim + param_dim
    h0, h1 = hidden_layers

    k1, k2, k3 = jax.random.split(key, 3)
    params = {
        "w1": init_std * jax.random.normal(k1, (input_size, h0), jnp.float32),
        "b1": jnp.zeros((1, h0), jnp.float32),
        "w2": init_std * jax.random.normal(k2, (h0, h1), jnp.float32),
        "b2": jnp.zeros((1, h1), jnp.float32),
        "wo": init_std * jax.random.normal(k3, (h1, 1), jnp.float32),
        "bo": jnp.zeros((1, 1), jnp.float32),
    }
    return params


def _reference_forward(obs, actions, action_parameters, params):
    x = jnp.concatenate([obs, actions, action_parameters], axis=1)
    x = _leaky_relu(x @ params["w1"] + params["b1"])
    x = _leaky_relu(x @ params["w2"] + params["b2"])
    return x @ params["wo"] + params["bo"]


if __name__ == "__main__":
    # Small shapes consistent with the module.
    num_agents = 2
    obs_dim, act_dim, param_dim = 16, 4, 8      # per-agent dims
    hidden_layers = (32, 32)

    key = jax.random.PRNGKey(0)
    kp, ko, ka, kq = jax.random.split(key, 4)

    params = init_central_critic_params(
        kp, obs_dim, act_dim, param_dim, hidden_layers, num_agents)

    # --- primary small test (batch=2, single tile) ---
    batch = 2
    obs = jax.random.normal(ko, (batch, obs_dim * num_agents), jnp.float32)
    actions = jax.random.normal(ka, (batch, act_dim * num_agents), jnp.float32)
    action_parameters = jax.random.normal(
        kq, (batch, param_dim * num_agents), jnp.float32)

    q = central_critic_forward(obs, actions, action_parameters, params)
    jax.block_until_ready(q)

    q_ref = _reference_forward(obs, actions, action_parameters, params)
    assert q.shape == (batch, 1)
    # bf16 MXU inputs with f32 accumulation: expect <~1% relative deviation
    # from the pure-f32 reference.
    assert jnp.allclose(q, q_ref, atol=1e-3, rtol=5e-2), (q, q_ref)

    # --- ragged multi-tile test: verifies the no-pad / masked final tile path ---
    batch2 = 300
    ko2, ka2, kq2 = jax.random.split(jax.random.PRNGKey(1), 3)
    obs2 = jax.random.normal(ko2, (batch2, obs_dim * num_agents), jnp.float32)
    act2 = jax.random.normal(ka2, (batch2, act_dim * num_agents), jnp.float32)
    prm2 = jax.random.normal(kq2, (batch2, param_dim * num_agents), jnp.float32)

    q2 = central_critic_forward(obs2, act2, prm2, params, batch_tile=128)
    jax.block_until_ready(q2)
    q2_ref = _reference_forward(obs2, act2, prm2, params)
    assert q2.shape == (batch2, 1)
    assert jnp.allclose(q2, q2_ref, atol=1e-3, rtol=5e-2)

    print("KERNEL_OK")
</pallas_src>

<mosaic_0001>
module attributes {stable_mosaic.version = 11 : i64} {
  func.func @central_critic_kernel(%arg0: i32, %arg1: memref<8x32xf32, #tpu.memory_space<vmem>>, %arg2: memref<8x8xf32, #tpu.memory_space<vmem>>, %arg3: memref<8x16xf32, #tpu.memory_space<vmem>>, %arg4: memref<32x32xbf16, #tpu.memory_space<vmem>>, %arg5: memref<8x32xbf16, #tpu.memory_space<vmem>>, %arg6: memref<16x32xbf16, #tpu.memory_space<vmem>>, %arg7: memref<1x32xf32, #tpu.memory_space<vmem>>, %arg8: memref<32x32xbf16, #tpu.memory_space<vmem>>, %arg9: memref<1x32xf32, #tpu.memory_space<vmem>>, %arg10: memref<1x32xf32, #tpu.memory_space<vmem>>, %arg11: memref<1x1xf32, #tpu.memory_space<vmem>>, %arg12: memref<1x1x8xf32, #tpu.memory_space<vmem>>) attributes {dimension_semantics = [#tpu.dimension_semantics<parallel>], iteration_bounds = array<i64: 1>, scalar_prefetch = 0 : i64, scratch_operands = 0 : i64, tpu.core_type = #tpu.core_type<tc>, window_params = [{transform_indices = @transform_0, window_bounds = array<i64: 8, 32>}, {transform_indices = @transform_1, window_bounds = array<i64: 8, 8>}, {transform_indices = @transform_2, window_bounds = array<i64: 8, 16>}, {pipeline_mode = #tpu.pipeline_mode<synchronous>, transform_indices = @transform_3, window_bounds = array<i64: 32, 32>}, {pipeline_mode = #tpu.pipeline_mode<synchronous>, transform_indices = @transform_4, window_bounds = array<i64: 8, 32>}, {pipeline_mode = #tpu.pipeline_mode<synchronous>, transform_indices = @transform_5, window_bounds = array<i64: 16, 32>}, {pipeline_mode = #tpu.pipeline_mode<synchronous>, transform_indices = @transform_6, window_bounds = array<i64: 1, 32>}, {pipeline_mode = #tpu.pipeline_mode<synchronous>, transform_indices = @transform_7, window_bounds = array<i64: 32, 32>}, {pipeline_mode = #tpu.pipeline_mode<synchronous>, transform_indices = @transform_8, window_bounds = array<i64: 1, 32>}, {pipeline_mode = #tpu.pipeline_mode<synchronous>, transform_indices = @transform_9, window_bounds = array<i64: 1, 32>}, {pipeline_mode = #tpu.pipeline_mode<synchronous>, transform_indices = @transform_10, window_bounds = array<i64: 1, 1>}, {transform_indices = @transform_11, window_bounds = array<i64: 1, 1, 8>}]} {
    %c0 = arith.constant 0 : index
    %c0_0 = arith.constant 0 : index
    %0 = vector.load %arg1[%c0, %c0_0] : memref<8x32xf32, #tpu.memory_space<vmem>>, vector<8x32xf32>
    %1 = arith.truncf %0 : vector<8x32xf32> to vector<8x32xbf16>
    %c0_1 = arith.constant 0 : index
    %c0_2 = arith.constant 0 : index
    %2 = vector.load %arg4[%c0_1, %c0_2] : memref<32x32xbf16, #tpu.memory_space<vmem>>, vector<32x32xbf16>
    %cst = arith.constant dense<0.000000e+00> : vector<8x32xf32>
    %3 = tpu.matmul %1, %2, %cst {dimension_numbers = #tpu.dot_dimension_numbers<[1], [0], [0], [1], [0, 0, 1, 1], [], []>} : vector<8x32xbf16>, vector<32x32xbf16>, vector<8x32xf32> -> vector<8x32xf32>
    %c0_3 = arith.constant 0 : index
    %c0_4 = arith.constant 0 : index
    %4 = vector.load %arg2[%c0_3, %c0_4] : memref<8x8xf32, #tpu.memory_space<vmem>>, vector<8x8xf32>
    %5 = arith.truncf %4 : vector<8x8xf32> to vector<8x8xbf16>
    %c0_5 = arith.constant 0 : index
    %c0_6 = arith.constant 0 : index
    %6 = vector.load %arg5[%c0_5, %c0_6] : memref<8x32xbf16, #tpu.memory_space<vmem>>, vector<8x32xbf16>
    %cst_7 = arith.constant dense<0.000000e+00> : vector<8x32xf32>
    %7 = tpu.matmul %5, %6, %cst_7 {dimension_numbers = #tpu.dot_dimension_numbers<[1], [0], [0], [1], [0, 0, 1, 1], [], []>} : vector<8x8xbf16>, vector<8x32xbf16>, vector<8x32xf32> -> vector<8x32xf32>
    %8 = arith.addf %3, %7 : vector<8x32xf32>
    %c0_8 = arith.constant 0 : index
    %c0_9 = arith.constant 0 : index
    %9 = vector.load %arg3[%c0_8, %c0_9] : memref<8x16xf32, #tpu.memory_space<vmem>>, vector<8x16xf32>
    %10 = arith.truncf %9 : vector<8x16xf32> to vector<8x16xbf16>
    %c0_10 = arith.constant 0 : index
    %c0_11 = arith.constant 0 : index
    %11 = vector.load %arg6[%c0_10, %c0_11] : memref<16x32xbf16, #tpu.memory_space<vmem>>, vector<16x32xbf16>
    %cst_12 = arith.constant dense<0.000000e+00> : vector<8x32xf32>
    %12 = tpu.matmul %10, %11, %cst_12 {dimension_numbers = #tpu.dot_dimension_numbers<[1], [0], [0], [1], [0, 0, 1, 1], [], []>} : vector<8x16xbf16>, vector<16x32xbf16>, vector<8x32xf32> -> vector<8x32xf32>
    %13 = arith.addf %8, %12 : vector<8x32xf32>
    %c0_13 = arith.constant 0 : index
    %c0_14 = arith.constant 0 : index
    %14 = vector.load %arg7[%c0_13, %c0_14] : memref<1x32xf32, #tpu.memory_space<vmem>>, vector<1x32xf32>
    %15 = vector.broadcast %14 : vector<1x32xf32> to vector<8x32xf32>
    %16 = arith.addf %13, %15 : vector<8x32xf32>
    %cst_15 = arith.constant 0.000000e+00 : f32
    %17 = vector.broadcast %cst_15 : f32 to vector<8x32xf32>
    %18 = arith.cmpf ogt, %16, %17 : vector<8x32xf32>
    %cst_16 = arith.constant 0.00999999977 : f32
    %19 = vector.broadcast %cst_16 : f32 to vector<8x32xf32>
    %20 = arith.mulf %19, %16 : vector<8x32xf32>
    %21 = arith.select %18, %16, %20 : vector<8x32xi1>, vector<8x32xf32>
    %22 = arith.truncf %21 : vector<8x32xf32> to vector<8x32xbf16>
    %c0_17 = arith.constant 0 : index
    %c0_18 = arith.constant 0 : index
    %23 = vector.load %arg8[%c0_17, %c0_18] : memref<32x32xbf16, #tpu.memory_space<vmem>>, vector<32x32xbf16>
    %cst_19 = arith.constant dense<0.000000e+00> : vector<8x32xf32>
    %24 = tpu.matmul %22, %23, %cst_19 {dimension_numbers = #tpu.dot_dimension_numbers<[1], [0], [0], [1], [0, 0, 1, 1], [], []>} : vector<8x32xbf16>, vector<32x32xbf16>, vector<8x32xf32> -> vector<8x32xf32>
    %c0_20 = arith.constant 0 : index
    %c0_21 = arith.constant 0 : index
    %25 = vector.load %arg9[%c0_20, %c0_21] : memref<1x32xf32, #tpu.memory_space<vmem>>, vector<1x32xf32>
    %26 = vector.broadcast %25 : vector<1x32xf32> to vector<8x32xf32>
    %27 = arith.addf %24, %26 : vector<8x32xf32>
    %cst_22 = arith.constant 0.000000e+00 : f32
    %28 = vector.broadcast %cst_22 : f32 to vector<8x32xf32>
    %29 = arith.cmpf ogt, %27, %28 : vector<8x32xf32>
    %cst_23 = arith.constant 0.00999999977 : f32
    %30 = vector.broadcast %cst_23 : f32 to vector<8x32xf32>
    %31 = arith.mulf %30, %27 : vector<8x32xf32>
    %32 = arith.select %29, %27, %31 : vector<8x32xi1>, vector<8x32xf32>
    %c0_24 = arith.constant 0 : index
    %c0_25 = arith.constant 0 : index
    %33 = vector.load %arg10[%c0_24, %c0_25] : memref<1x32xf32, #tpu.memory_space<vmem>>, vector<1x32xf32>
    "tpu.trace_start"() <{level = 10 : i32, message = "oh,bh->ob"}> : () -> ()
    %cst_26 = arith.constant dense<0.000000e+00> : vector<1x8xf32>
    %34 = tpu.matmul %33, %32, %cst_26 {dimension_numbers = #tpu.dot_dimension_numbers<[1], [1], [0], [0], [0, 0, 1, 0], [], []>} : vector<1x32xf32>, vector<8x32xf32>, vector<1x8xf32> -> vector<1x8xf32>
    "tpu.trace_stop"() : () -> ()
    %c0_27 = arith.constant 0 : index
    %c0_28 = arith.constant 0 : index
    %35 = vector.load %arg11[%c0_27, %c0_28] : memref<1x1xf32, #tpu.memory_space<vmem>>, vector<1x1xf32>
    %36 = vector.broadcast %35 : vector<1x1xf32> to vector<1x8xf32>
    %37 = arith.addf %34, %36 : vector<1x8xf32>
    %38 = vector.shape_cast %37 : vector<1x8xf32> to vector<1x1x8xf32>
    %c0_29 = arith.constant 0 : index
    %c0_30 = arith.constant 0 : index
    %c0_31 = arith.constant 0 : index
    %39 = vector.load %arg12[%c0_29, %c0_30, %c0_31] : memref<1x1x8xf32, #tpu.memory_space<vmem>>, vector<1x1x8xf32>
    tpu.vector_store %arg12[%c0_29, %c0_30, %c0_31], %38 {strides = array<i32>} : memref<1x1x8xf32, #tpu.memory_space<vmem>>, vector<1x1x8xf32>,
    return
  }
  func.func @transform_0(%arg0: i32) -> (i32, i32) {
    %c0_i32 = arith.constant 0 : i32
    %c0_i32_0 = arith.constant 0 : i32
    return %arg0, %c0_i32 : i32, i32
  }
  func.func @transform_1(%arg0: i32) -> (i32, i32) {
    %c0_i32 = arith.constant 0 : i32
    %c0_i32_0 = arith.constant 0 : i32
    return %arg0, %c0_i32 : i32, i32
  }
  func.func @transform_2(%arg0: i32) -> (i32, i32) {
    %c0_i32 = arith.constant 0 : i32
    %c0_i32_0 = arith.constant 0 : i32
    return %arg0, %c0_i32 : i32, i32
  }
  func.func @transform_3(%arg0: i32) -> (i32, i32) {
    %c0_i32 = arith.constant 0 : i32
    %c0_i32_0 = arith.constant 0 : i32
    %c0_i32_1 = arith.constant 0 : i32
    return %c0_i32, %c0_i32_0 : i32, i32
  }
  func.func @transform_4(%arg0: i32) -> (i32, i32) {
    %c0_i32 = arith.constant 0 : i32
    %c0_i32_0 = arith.constant 0 : i32
    %c0_i32_1 = arith.constant 0 : i32
    return %c0_i32, %c0_i32_0 : i32, i32
  }
  func.func @transform_5(%arg0: i32) -> (i32, i32) {
    %c0_i32 = arith.constant 0 : i32
    %c0_i32_0 = arith.constant 0 : i32
    %c0_i32_1 = arith.constant 0 : i32
    return %c0_i32, %c0_i32_0 : i32, i32
  }
  func.func @transform_6(%arg0: i32) -> (i32, i32) {
    %c0_i32 = arith.constant 0 : i32
    %c0_i32_0 = arith.constant 0 : i32
    %c0_i32_1 = arith.constant 0 : i32
    return %c0_i32, %c0_i32_0 : i32, i32
  }
  func.func @transform_7(%arg0: i32) -> (i32, i32) {
    %c0_i32 = arith.constant 0 : i32
    %c0_i32_0 = arith.constant 0 : i32
    %c0_i32_1 = arith.constant 0 : i32
    return %c0_i32, %c0_i32_0 : i32, i32
  }
  func.func @transform_8(%arg0: i32) -> (i32, i32) {
    %c0_i32 = arith.constant 0 : i32
    %c0_i32_0 = arith.constant 0 : i32
    %c0_i32_1 = arith.constant 0 : i32
    return %c0_i32, %c0_i32_0 : i32, i32
  }
  func.func @transform_9(%arg0: i32) -> (i32, i32) {
    %c0_i32 = arith.constant 0 : i32
    %c0_i32_0 = arith.constant 0 : i32
    %c0_i32_1 = arith.constant 0 : i32
    return %c0_i32, %c0_i32_0 : i32, i32
  }
  func.func @transform_10(%arg0: i32) -> (i32, i32) {
    %c0_i32 = arith.constant 0 : i32
    %c0_i32_0 = arith.constant 0 : i32
    %c0_i32_1 = arith.constant 0 : i32
    return %c0_i32, %c0_i32_0 : i32, i32
  }
  func.func @transform_11(%arg0: i32) -> (i32, i32, i32) {
    %c0_i32 = arith.constant 0 : i32
    %c0_i32_0 = arith.constant 0 : i32
    %c0_i32_1 = arith.constant 0 : i32
    return %arg0, %c0_i32, %c0_i32_0 : i32, i32, i32
  }
}

</mosaic_0001>

<bundles_post_ra>
// kernel: central_critic_forward.1
= control target key start
LH: loop header
LB: loop body
LE: loop exit
PB: predicated region body
PF: predicated region fallthrough
CT: control target
= control target key end

     0   :  { %vm54_vm0 = vcmask 1043456   ;;  %vm50_vm1 = vcmask 64512   ;;  %vm110_vm2 = vcmask 130048   ;;  %vm83_vm3 = vcmask 261120   ;;  %s358_s4 = inlined_call_operand.vmem [shape: bf16[8,32], index: 4, kind: input, shape index: {}]   ;;  %s359_s3 = inlined_call_operand.vmem [shape: bf16[32,32], index: 3, kind: input, shape index: {}]   ;;  %s360_s5 = inlined_call_operand.vmem [shape: bf16[16,32], index: 5, kind: input, shape index: {}]   ;;  %s361_s1 = inlined_call_operand.vmem [shape: f32[2,8], index: 1, kind: input, shape index: {}]   ;;  %s362_s2 = inlined_call_operand.vmem [shape: f32[2,16], index: 2, kind: input, shape index: {}]   ;;  %s363_s0 = inlined_call_operand.vmem [shape: f32[2,32], index: 0, kind: input, shape index: {}]   ;;  %s364_s6 = inlined_call_operand.vmem [shape: f32[1,32], index: 6, kind: input, shape index: {}]   ;;  %s365_s8 = inlined_call_operand.vmem [shape: f32[1,32], index: 8, kind: input, shape index: {}]   ;;  %s366_s7 = inlined_call_operand.vmem [shape: bf16[32,32], index: 7, kind: input, shape index: {}]   ;;  %s367_s10 = inlined_call_operand.<no memory space> [shape: f32[1,1], index: 10, kind: input, shape index: {}]   ;;  %s368_s9 = inlined_call_operand.vmem [shape: f32[1,32], index: 9, kind: input, shape index: {}]   ;;  %s369_s11 = inlined_call_operand.vmem [shape: f32[1,1,8], index: 11, kind: output, shape index: {}]  }
   0x1   :  { %v49_v0 = vld [vmem:[%s358_s4] sm:$0xf]  ;;  %v243_v1 = vld [vmem:[%s359_s3 + $0x8] sm:$0xff]  ;;  %v16_v26 = vstv %s367_s10  ;;  %v251_v27 = vmov 0   ;;  %vm210_vm6 = vcmask 57344  }
   0x2   :  { %v244_v2 = vld [vmem:[%s360_s5] sm:$0xff]  ;;  %v56_v3 = vsel %vm54_vm0, %v49_v0, 0  ;;  %93 = vmatpush.bf16.msra.mxu1 %v243_v1  ;;  %v246_v11 = vld [vmem:[%s366_s7 + $0x8] sm:$0xff]  ;;  %248 = vset.pattern.permute.xlu0 %v251_v27  ;;  %17 = vst [vmem:[#allocation2] sm:$0x1] %v16_v26 }
   0x3   :  { %v47_v4 = vld [vmem:[%s361_s1] sm:$0xff]  ;;  %65 = vmatpush.bf16.msra.mxu0 %v56_v3  ;;  %121 = vmatpush.bf16.msra.mxu2 %v244_v2 }
   0x4   :  { %v100_v5 = vld [vmem:[%s362_s2] sm:$0xff]  ;;  %v48_v6 = vpack.c.bf16 %v47_v4, %v47_v4  ;;  %166 = vmatpush.bf16.msra.mxu3 %v246_v11 }
   0x5   :  { %v101_v7 = vpack.c.bf16 %v100_v5, %v100_v5  ;;  %v242_v8 = vld [vmem:[%s359_s3] sm:$0xff] }
   0x6   :  { %v41_v9 = vld [vmem:[%s363_s0] sm:$0xff]  ;;  %216 = vmatmul.msk.bf16.vlgmr.msra.gmra.mxu0 %vm50_vm1, %v48_v6  ;;  %94 = vmatpush.bf16.msra.mxu1 %v242_v8 }
   0x7   :  { %v42_v10 = vpack.c.bf16 %v41_v9, %v41_v9  ;;  %230 = vmatmul.msk.bf16.vlgmr.msra.gmra.mxu2 %vm110_vm2, %v101_v7  ;;  %v245_v12 = vld [vmem:[%s366_s7] sm:$0xff] }
   0x8   :  { %167 = vmatpush.bf16.msra.mxu3 %v245_v12  ;;  %v249_v16 = vld [vmem:[%s364_s6] ss:$0 sm:$0xff] }
   0x9   :  { %225 = vmatmul.msk.bf16.vlgmr.msra.gmra.mxu1 %vm83_vm3, %v42_v10  ;;  %v177_v28 = vld [vmem:[#allocation2] sm:$0x1] }
   0xa   :  { %180 = vperm.xlu0 %248, %v177_v28   ;;  %v250_v29 = vld [vmem:[%s365_s8] ss:$0 sm:$0xff] }
   0xb   :  { %v176_v34 = vld [vmem:[%s368_s9] sm:$0x1] }
  0x7c   :  { %v181_v36 = vpop.permute.xlu0 %180 }
  0x7d   :  { %v183_v37 = vperm.slane %v181_v36, 0 }
  0x83   :  { %v67_v13 = vpop.f32.mrf.mxu0 }
  0x86   :  { %v96_v14 = vpop.f32.mrf.mxu1 }
  0x87   :  { %v97_v15 = vadd.f32 %v96_v14, %v67_v13 }
  0x8a   :  { %v123_v17 = vpop.f32.mrf.mxu2 }
  0x8b   :  { %v127_v18 = vadd.f32 %v123_v17, %v97_v15  ;;  %v69_v19 = vpop.f32.mrf.mxu0 }
  0x8d   :  { %v132_v20 = vadd.f32 %v249_v16, %v127_v18 }
  0x8e   :  { %v98_v22 = vpop.f32.mrf.mxu1 }
  0x8f   :  { %v134_v21 = vmul.f32 0.01, %v132_v20  ;;  %vm133_vm4 = vcmp.gt.f32.partialorder %v132_v20, 0.0 }
  0x91   :  { %v135_v23 = vsel %vm133_vm4, %v132_v20, %v134_v21 }
  0x92   :  { %v125_v24 = vpop.f32.mrf.mxu2  ;;  %v136_v25 = vpack.c.bf16 %v135_v23, %v135_v23 }
  0x94   :  { %239 = vmatmul.msk.bf16.vlgmr.msra.gmra.mxu3 %vm83_vm3, %v136_v25 }
 0x117   :  { %v169_v30 = vpop.f32.mrf.mxu3 }
 0x118   :  { %v170_v31 = vadd.f32 %v250_v29, %v169_v30 }
 0x11a   :  { %v174_v32 = vmul.f32 0.01, %v170_v31  ;;  %vm173_vm5 = vcmp.gt.f32.partialorder %v170_v31, 0.0 }
 0x11c   :  { %v175_v33 = vsel %vm173_vm5, %v170_v31, %v174_v32 }
 0x11d   :  { %240 = vmatpush.xpose.msk.msrb.mxu0 %vm83_vm3, %v175_v33 }
 0x11f   :  { %v171_v35 = vpop.f32.mrf.mxu3 }
 0x120   :  { %241 = vmatmul.msk.f32.vlgmr.msrb.gmra.mxu0 %vm83_vm3, %v176_v34 }
 0x19d   :  { %v207_v38 = vpop.f32.mrf.mxu0 }
 0x19e   :  { %v208_v39 = vadd.f32 %v207_v38, %v183_v37 }
 0x1a0   :  { %211 = vst.msk [vmem:[%s369_s11] sm:$0x1] %vm210_vm6, %v208_v39 }

</bundles_post_ra>
